<compile_context>
chip_gen: v7x
topology: tpu7x:2x2x1
jax: 0.10.0
libtpu: 0.0.40
codegen_flags: <defaults>
</compile_context>

<pallas_src>
import functools

import jax
import jax.numpy as jnp
from jax.experimental import pallas as pl
from jax.experimental.pallas import tpu as pltpu


def _round_up(x, m):
    return ((x + m - 1) // m) * m


def _default_parallel_splits():
    """2 on dual-TensorCore chips (v7x), 1 on single-TC chips (v5e/v6e)."""
    try:
        kind = jax.devices()[0].device_kind.lower()
    except Exception:
        return 1
    return 2 if ("v7" in kind or "tpu7" in kind) else 1


def bondnet_kernel(node_ref, d2_ref, seg_ref, w1_ref, b1_ref, w2_ref, c_ref,
                   out_ref, *, sub_block):
    """One bond-tile step.

    node_ref : (TB, Fr)    bf16/f32  VMEM  r[b0] + r[b1] for this tile of bonds
    d2_ref   : (TB, 1)     f32       VMEM  squared bond length
    seg_ref  : (TB, 1)     int32     VMEM  molecule id of each bond (-1 = padding)
    w1_ref   : (Fr, 2H)    bf16/f32  VMEM  fused first-layer weights [r0 | k]
    b1_ref   : (1, 2H)     f32       VMEM  fused first-layer biases
    w2_ref   : (2H, 128)   f32       VMEM  second layers; lane 0 = r0 head, lane 1 = k head
    c_ref    : (2,)        f32       SMEM  [sqrt(1.5)+0.1*b2_r0, 10+b2_k]
    out_ref  : (1,1,NMp)   f32       VMEM  per-(parallel half) molecular energies
                                           (resident across the bond-tile axis)
    """
    t = pl.program_id(1)
    TB = node_ref.shape[0]
    NMp = out_ref.shape[-1]

    @pl.when(t == 0)
    def _init():
        out_ref[...] = jnp.zeros_like(out_ref)

    # --- fused first layers of both ParameterPredictors: one MXU matmul + tanh.
    h = jnp.tanh(
        jnp.dot(node_ref[...], w1_ref[...], preferred_element_type=jnp.float32)
        + b1_ref[...])                                                  # (TB, 2H) f32

    # --- fused second layers (H -> 1, twice) as one more (idle-)MXU matmul.
    raw = jnp.dot(h, w2_ref[...], preferred_element_type=jnp.float32)   # (TB, 128)
    r0 = (c_ref[0] + jnp.float32(0.1) * raw[:, 0:1]) ** 2               # (TB, 1)
    k = (c_ref[1] + raw[:, 1:2]) ** 2                                   # (TB, 1)

    dist = jnp.sqrt(d2_ref[...])                                        # (TB, 1)
    e_bond = jnp.float32(0.5) * k * (dist - r0) ** 2                    # (TB, 1)

    # --- per-molecule segment sum, no O(NM*NB) HBM one-hot.  Processed in fixed
    # sub-blocks so the (SB, NMp) intermediate stays small as TB grows.
    # Padded bonds carry seg id -1 and therefore never match any molecule lane.
    seg = seg_ref[...]                                                  # (TB, 1) int32
    mol_ids = jax.lax.broadcasted_iota(jnp.int32, (sub_block, NMp), 1)
    acc = jnp.zeros((1, NMp), jnp.float32)
    for s in range(TB // sub_block):
        sl = slice(s * sub_block, (s + 1) * sub_block)
        contrib = jnp.where(seg[sl, :] == mol_ids, e_bond[sl, :], jnp.float32(0.0))
        acc = acc + jnp.sum(contrib, axis=0, keepdims=True)             # (1, NMp)

    out_ref[...] += acc[None]


def bondnet_forward(r, xyz, bonds, num_bonds, params, *,
                    tile_bonds=2048, parallel_splits=None, use_bf16_matmul=True):
    """JAX wrapper: gathers/padding/weight-fusion in plain JAX, hot path in Pallas."""
    NB = bonds.shape[0]
    NM = len(num_bonds)
    assert sum(int(n) for n in num_bonds) == NB, "bonds must be grouped by molecule"
    Fr = r.shape[1]
    H = params["w1_r0"].shape[1]
    H2 = 2 * H
    NP2 = 128                       # lane-padded second-layer output width

    # --- tiling: P parallel halves (one per TensorCore) x T bond tiles of TB ---
    P = _default_parallel_splits() if parallel_splits is None else max(1, int(parallel_splits))
    per_half = -(-NB // P)
    TB = max(8, min(int(tile_bonds), _round_up(per_half, 8)))
    if TB > 256:
        TB = _round_up(TB, 256)     # sub-block the segment accumulate at 256 bonds
        SB = 256
    else:
        SB = TB
    T = max(1, -(-per_half // TB))
    NB_pad = P * T * TB
    NM_pad = max(128, _round_up(NM, 128))    # lane-dense accumulator width

    # --- glue: gathers + bond geometry (data-dependent indexing stays in XLA) ---
    # TODO(synk): keep `r` resident in VMEM and gather r[b0]+r[b1] inside the
    # kernel from a (TB, 2) bond-index tile to remove the node_input HBM round-trip.
    node_input = r[bonds[:, 0]] + r[bonds[:, 1]]                  # (NB, Fr)
    diff = xyz[bonds[:, 1]] - xyz[bonds[:, 0]]                    # (NB, 3)
    d2 = jnp.sum(diff * diff, axis=1, keepdims=True)              # (NB, 1)
    seg_ids = jnp.repeat(jnp.arange(NM, dtype=jnp.int32),
                         jnp.asarray(num_bonds),
                         total_repeat_length=NB)[:, None]         # (NB, 1)

    pad = NB_pad - NB
    node_input = jnp.pad(node_input, ((0, pad), (0, 0)))
    d2 = jnp.pad(d2, ((0, pad), (0, 0)))
    seg_ids = jnp.pad(seg_ids, ((0, pad), (0, 0)), constant_values=-1)

    in_dtype = jnp.bfloat16 if use_bf16_matmul else jnp.float32
    node_input = node_input.astype(in_dtype)      # dominant HBM stream -> bf16 by default

    # --- fuse the two ParameterPredictor MLPs ---
    w1 = jnp.concatenate([params["w1_r0"], params["w1_k"]], axis=1).astype(in_dtype)      # (Fr, 2H)
    b1 = jnp.concatenate([params["b1_r0"], params["b1_k"]], axis=1).astype(jnp.float32)   # (1, 2H)
    w2 = jnp.zeros((H2, NP2), jnp.float32)
    w2 = w2.at[:H, 0].set(params["w2_r0"][:, 0])                  # lane 0: r0 head
    w2 = w2.at[H:, 1].set(params["w2_k"][:, 0])                   # lane 1: k head
    c = jnp.stack([
        jnp.float32(1.5 ** 0.5) + jnp.float32(0.1) * params["b2_r0"].reshape(()),
        jnp.float32(10.0) + params["b2_k"].reshape(()),
    ]).astype(jnp.float32)                                        # (2,) SMEM constants

    bond_block = lambda blk: pl.BlockSpec(blk, lambda p, t: (p * T + t, 0))
    resident = lambda blk: pl.BlockSpec(blk, lambda p, t: (0, 0))

    in_bytes = 2 if use_bf16_matmul else 4
    flops = (2 * NB_pad * Fr * H2            # fused first-layer matmul
             + 2 * NB_pad * H2 * 2           # fused second-layer matmul (2 heads)
             + 3 * NB_pad * NM_pad           # segment mask + accumulate
             + 16 * NB_pad)                  # elementwise energy math
    transcendentals = NB_pad * (H2 + 1)      # tanh + sqrt
    bytes_accessed = (NB_pad * Fr * in_bytes + 8 * NB_pad
                      + in_bytes * Fr * H2 + 4 * (H2 + H2 * NP2 + 2)
                      + 4 * P * NM_pad)

    out = pl.pallas_call(
        functools.partial(bondnet_kernel, sub_block=SB),
        out_shape=jax.ShapeDtypeStruct((P, 1, NM_pad), jnp.float32),
        grid=(P, T),
        in_specs=[
            bond_block((TB, Fr)),    # node_input tile
            bond_block((TB, 1)),     # squared distance tile
            bond_block((TB, 1)),     # molecule-id tile
            resident((Fr, H2)),      # fused w1
            resident((1, H2)),       # fused b1
            resident((H2, NP2)),     # fused second-layer weights (lane-padded)
            pl.BlockSpec(memory_space=pltpu.MemorySpace.SMEM),   # c scalars
        ],
        out_specs=pl.BlockSpec((1, 1, NM_pad), lambda p, t: (p, 0, 0)),
        compiler_params=pltpu.CompilerParams(
            dimension_semantics=("parallel", "arbitrary"),
            vmem_limit_bytes=32 * 1024 * 1024),
        cost_estimate=pl.CostEstimate(
            flops=int(flops),
            transcendentals=int(transcendentals),
            bytes_accessed=int(bytes_accessed)),
    )(node_input, d2, seg_ids, w1, b1, w2, c)

    # combine the parallel halves and drop molecule padding -> (NM, 1)
    return jnp.sum(out, axis=(0, 1))[:NM][:, None]


def bondnet_reference(r, xyz, bonds, num_bonds, params):
    """Pure-JAX reference mirroring the PyTorch forward."""
    node_input = r[bonds[:, 0]] + r[bonds[:, 1]]
    diff = xyz[bonds[:, 1]] - xyz[bonds[:, 0]]
    dist = jnp.sqrt(jnp.sum(diff * diff, axis=1, keepdims=True))

    h_r = jnp.tanh(node_input @ params["w1_r0"] + params["b1_r0"])
    r0_raw = h_r @ params["w2_r0"] + params["b2_r0"]
    h_k = jnp.tanh(node_input @ params["w1_k"] + params["b1_k"])
    k_raw = h_k @ params["w2_k"] + params["b2_k"]

    r0 = (1.5 ** 0.5 + 0.1 * r0_raw) ** 2
    k = (100.0 ** 0.5 + k_raw) ** 2
    e_bond = k / 2.0 * (dist - r0) ** 2

    outs = []
    start = 0
    for nb in num_bonds:
        outs.append(jnp.sum(e_bond[start:start + nb], axis=0))
        start += nb
    return jnp.stack(outs)


def init_params(key, Fr, H):
    """Deterministic init of the two ParameterPredictor MLPs (Lh=[H], L_out=1)."""
    ks = jax.random.split(key, 8)
    scale = 0.1
    return {
        "w1_r0": scale * jax.random.normal(ks[0], (Fr, H), jnp.float32),
        "b1_r0": scale * jax.random.normal(ks[1], (1, H), jnp.float32),
        "w2_r0": scale * jax.random.normal(ks[2], (H, 1), jnp.float32),
        "b2_r0": scale * jax.random.normal(ks[3], (1, 1), jnp.float32),
        "w1_k": scale * jax.random.normal(ks[4], (Fr, H), jnp.float32),
        "b1_k": scale * jax.random.normal(ks[5], (1, H), jnp.float32),
        "w2_k": scale * jax.random.normal(ks[6], (H, 1), jnp.float32),
        "b2_k": scale * jax.random.normal(ks[7], (1, 1), jnp.float32),
    }


if __name__ == "__main__":
    key = jax.random.PRNGKey(0)
    N_atoms = 16        # number of atoms
    Fr = 32             # node feature dim
    H = 32              # hidden dim (Lh = [32])
    num_bonds = [8, 8]  # bonds per molecule (static, as in batch['num_bonds'])
    NB = sum(num_bonds)

    k_r, k_xyz, k_b0, k_b1, k_p = jax.random.split(key, 5)
    r = jax.random.normal(k_r, (N_atoms, Fr), jnp.float32)
    xyz = jax.random.normal(k_xyz, (N_atoms, 3), jnp.float32)
    b0 = jax.random.randint(k_b0, (NB,), 0, N_atoms)
    b1 = (b0 + 1 + jax.random.randint(k_b1, (NB,), 0, N_atoms - 1)) % N_atoms
    bonds = jnp.stack([b0, b1], axis=1).astype(jnp.int32)        # (NB, 2)

    params = init_params(k_p, Fr, H)
    ref = bondnet_reference(r, xyz, bonds, num_bonds, params)

    # Exact f32 path: matches the pure-JAX reference tightly.
    out_f32 = jax.block_until_ready(
        bondnet_forward(r, xyz, bonds, num_bonds, params, use_bf16_matmul=False))
    assert out_f32.shape == (len(num_bonds), 1)
    assert jnp.allclose(out_f32, ref, rtol=1e-5, atol=1e-5), (out_f32, ref)

    # Default (bf16 MXU operands) path: halves HBM traffic, looser tolerance.
    out_bf16 = jax.block_until_ready(
        bondnet_forward(r, xyz, bonds, num_bonds, params))
    assert out_bf16.shape == (len(num_bonds), 1)
    assert jnp.allclose(out_bf16, ref, rtol=5e-2, atol=1.0), (out_bf16, ref)

    print("KERNEL_OK")
</pallas_src>

<mosaic_0001>
module attributes {stable_mosaic.version = 11 : i64} {
  func.func @bondnet_kernel(%arg0: i32, %arg1: i32, %arg2: memref<16x32xf32, #tpu.memory_space<vmem>>, %arg3: memref<16x1xf32, #tpu.memory_space<vmem>>, %arg4: memref<16x1xi32, #tpu.memory_space<vmem>>, %arg5: memref<32x64xf32, #tpu.memory_space<vmem>>, %arg6: memref<1x64xf32, #tpu.memory_space<vmem>>, %arg7: memref<64x128xf32, #tpu.memory_space<vmem>>, %arg8: memref<2xf32, #tpu.memory_space<smem>>, %arg9: memref<1x1x128xf32, #tpu.memory_space<vmem>>) attributes {dimension_semantics = [#tpu.dimension_semantics<parallel>, #tpu.dimension_semantics<arbitrary>], iteration_bounds = array<i64: 1, 1>, scalar_prefetch = 0 : i64, scratch_operands = 0 : i64, tpu.core_type = #tpu.core_type<tc>, window_params = [{transform_indices = @transform_0, window_bounds = array<i64: 16, 32>}, {transform_indices = @transform_1, window_bounds = array<i64: 16, 1>}, {transform_indices = @transform_2, window_bounds = array<i64: 16, 1>}, {pipeline_mode = #tpu.pipeline_mode<synchronous>, transform_indices = @transform_3, window_bounds = array<i64: 32, 64>}, {pipeline_mode = #tpu.pipeline_mode<synchronous>, transform_indices = @transform_4, window_bounds = array<i64: 1, 64>}, {pipeline_mode = #tpu.pipeline_mode<synchronous>, transform_indices = @transform_5, window_bounds = array<i64: 64, 128>}, {transform_indices = @transform_6, window_bounds = array<i64: 2>}, {transform_indices = @transform_7, window_bounds = array<i64: 1, 1, 128>}]} {
    %c0_i32 = arith.constant 0 : i32
    %0 = arith.cmpi eq, %arg1, %c0_i32 : i32
    %1 = arith.extui %0 : i1 to i32
    %c0_i32_0 = arith.constant 0 : i32
    %2 = arith.cmpi ne, %1, %c0_i32_0 : i32
    scf.if %2 {
      %cst_25 = arith.constant 0.000000e+00 : f32
      %47 = vector.broadcast %cst_25 : f32 to vector<1x1x128xf32>
      %c0_26 = arith.constant 0 : index
      %c0_27 = arith.constant 0 : index
      %c0_28 = arith.constant 0 : index
      %48 = vector.load %arg9[%c0_26, %c0_27, %c0_28] : memref<1x1x128xf32, #tpu.memory_space<vmem>>, vector<1x1x128xf32>
      tpu.vector_store %arg9[%c0_26, %c0_27, %c0_28], %47 {strides = array<i32>} : memref<1x1x128xf32, #tpu.memory_space<vmem>>, vector<1x1x128xf32>,
    } else {
    }
    %c0 = arith.constant 0 : index
    %c0_1 = arith.constant 0 : index
    %3 = vector.load %arg2[%c0, %c0_1] : memref<16x32xf32, #tpu.memory_space<vmem>>, vector<16x32xf32>
    %c0_2 = arith.constant 0 : index
    %c0_3 = arith.constant 0 : index
    %4 = vector.load %arg5[%c0_2, %c0_3] : memref<32x64xf32, #tpu.memory_space<vmem>>, vector<32x64xf32>
    %cst = arith.constant dense<0.000000e+00> : vector<16x64xf32>
    %5 = tpu.matmul %3, %4, %cst {dimension_numbers = #tpu.dot_dimension_numbers<[1], [0], [0], [1], [0, 0, 1, 1], [], []>} : vector<16x32xf32>, vector<32x64xf32>, vector<16x64xf32> -> vector<16x64xf32>
    %c0_4 = arith.constant 0 : index
    %c0_5 = arith.constant 0 : index
    %6 = vector.load %arg6[%c0_4, %c0_5] : memref<1x64xf32, #tpu.memory_space<vmem>>, vector<1x64xf32>
    %7 = vector.broadcast %6 : vector<1x64xf32> to vector<16x64xf32>
    %8 = arith.addf %5, %7 : vector<16x64xf32>
    %9 = math.tanh %8 : vector<16x64xf32>
    %c0_6 = arith.constant 0 : index
    %c0_7 = arith.constant 0 : index
    %10 = vector.load %arg7[%c0_6, %c0_7] : memref<64x128xf32, #tpu.memory_space<vmem>>, vector<64x128xf32>
    %cst_8 = arith.constant dense<0.000000e+00> : vector<16x128xf32>
    %11 = tpu.matmul %9, %10, %cst_8 {dimension_numbers = #tpu.dot_dimension_numbers<[1], [0], [0], [1], [0, 0, 1, 1], [], []>} : vector<16x64xf32>, vector<64x128xf32>, vector<16x128xf32> -> vector<16x128xf32>
    %c0_9 = arith.constant 0 : index
    %12 = memref.load %arg8[%c0_9] : memref<2xf32, #tpu.memory_space<smem>>
    %13 = vector.extract_strided_slice %11 {offsets = [0, 0], sizes = [16, 1], strides = [1, 1]} : vector<16x128xf32> to vector<16x1xf32>
    %cst_10 = arith.constant 1.000000e-01 : f32
    %14 = vector.broadcast %cst_10 : f32 to vector<16x1xf32>
    %15 = arith.mulf %14, %13 : vector<16x1xf32>
    %16 = vector.broadcast %12 : f32 to vector<16x1xf32>
    %17 = arith.addf %16, %15 : vector<16x1xf32>
    %18 = arith.mulf %17, %17 : vector<16x1xf32>
    %c1 = arith.constant 1 : index
    %19 = memref.load %arg8[%c1] : memref<2xf32, #tpu.memory_space<smem>>
    %20 = vector.extract_strided_slice %11 {offsets = [0, 1], sizes = [16, 1], strides = [1, 1]} : vector<16x128xf32> to vector<16x1xf32>
    %21 = vector.broadcast %19 : f32 to vector<16x1xf32>
    %22 = arith.addf %21, %20 : vector<16x1xf32>
    %23 = arith.mulf %22, %22 : vector<16x1xf32>
    %c0_11 = arith.constant 0 : index
    %c0_12 = arith.constant 0 : index
    %24 = vector.load %arg3[%c0_11, %c0_12] : memref<16x1xf32, #tpu.memory_space<vmem>>, vector<16x1xf32>
    %25 = math.sqrt %24 : vector<16x1xf32>
    %cst_13 = arith.constant 5.000000e-01 : f32
    %26 = vector.broadcast %cst_13 : f32 to vector<16x1xf32>
    %27 = arith.mulf %26, %23 : vector<16x1xf32>
    %28 = arith.subf %25, %18 : vector<16x1xf32>
    %29 = arith.mulf %28, %28 : vector<16x1xf32>
    %30 = arith.mulf %27, %29 : vector<16x1xf32>
    %c0_14 = arith.constant 0 : index
    %c0_15 = arith.constant 0 : index
    %31 = vector.load %arg4[%c0_14, %c0_15] : memref<16x1xi32, #tpu.memory_space<vmem>>, vector<16x1xi32>
    %32 = tpu.iota {dimensions = array<i32: 1>} : vector<16x128xi32>
    %cst_16 = arith.constant 0.000000e+00 : f32
    %33 = vector.broadcast %cst_16 : f32 to vector<1x128xf32>
    %34 = vector.broadcast %31 : vector<16x1xi32> to vector<16x128xi32>
    %35 = arith.cmpi eq, %34, %32 : vector<16x128xi32>
    %cst_17 = arith.constant 0.000000e+00 : f32
    %36 = vector.shape_cast %30 : vector<16x1xf32> to vector<16x1xf32>
    %37 = vector.broadcast %36 : vector<16x1xf32> to vector<16x128xf32>
    %38 = vector.broadcast %cst_17 : f32 to vector<16x128xf32>
    %39 = arith.select %35, %37, %38 : vector<16x128xi1>, vector<16x128xf32>
    %cst_18 = arith.constant dense<0.000000e+00> : vector<128xf32>
    %40 = vector.multi_reduction <add>, %39, %cst_18 [0] : vector<16x128xf32> to vector<128xf32>
    %41 = vector.shape_cast %40 : vector<128xf32> to vector<1x128xf32>
    %42 = arith.addf %33, %41 : vector<1x128xf32>
    %c0_19 = arith.constant 0 : index
    %c0_20 = arith.constant 0 : index
    %c0_21 = arith.constant 0 : index
    %43 = vector.load %arg9[%c0_19, %c0_20, %c0_21] : memref<1x1x128xf32, #tpu.memory_space<vmem>>, vector<1x1x128xf32>
    %44 = vector.shape_cast %42 : vector<1x128xf32> to vector<1x1x128xf32>
    %45 = arith.addf %43, %44 : vector<1x1x128xf32>
    %c0_22 = arith.constant 0 : index
    %c0_23 = arith.constant 0 : index
    %c0_24 = arith.constant 0 : index
    %46 = vector.load %arg9[%c0_22, %c0_23, %c0_24] : memref<1x1x128xf32, #tpu.memory_space<vmem>>, vector<1x1x128xf32>
    tpu.vector_store %arg9[%c0_22, %c0_23, %c0_24], %45 {strides = array<i32>} : memref<1x1x128xf32, #tpu.memory_space<vmem>>, vector<1x1x128xf32>,
    return
  }
  func.func @transform_0(%arg0: i32, %arg1: i32) -> (i32, i32) {
    %c1_i32 = arith.constant 1 : i32
    %0 = arith.muli %arg0, %c1_i32 : i32
    %1 = arith.addi %0, %arg1 : i32
    %c0_i32 = arith.constant 0 : i32
    %c0_i32_0 = arith.constant 0 : i32
    return %1, %c0_i32 : i32, i32
  }
  func.func @transform_1(%arg0: i32, %arg1: i32) -> (i32, i32) {
    %c1_i32 = arith.constant 1 : i32
    %0 = arith.muli %arg0, %c1_i32 : i32
    %1 = arith.addi %0, %arg1 : i32
    %c0_i32 = arith.constant 0 : i32
    %c0_i32_0 = arith.constant 0 : i32
    return %1, %c0_i32 : i32, i32
  }
  func.func @transform_2(%arg0: i32, %arg1: i32) -> (i32, i32) {
    %c1_i32 = arith.constant 1 : i32
    %0 = arith.muli %arg0, %c1_i32 : i32
    %1 = arith.addi %0, %arg1 : i32
    %c0_i32 = arith.constant 0 : i32
    %c0_i32_0 = arith.constant 0 : i32
    return %1, %c0_i32 : i32, i32
  }
  func.func @transform_3(%arg0: i32, %arg1: i32) -> (i32, i32) {
    %c0_i32 = arith.constant 0 : i32
    %c0_i32_0 = arith.constant 0 : i32
    %c0_i32_1 = arith.constant 0 : i32
    return %c0_i32, %c0_i32_0 : i32, i32
  }
  func.func @transform_4(%arg0: i32, %arg1: i32) -> (i32, i32) {
    %c0_i32 = arith.constant 0 : i32
    %c0_i32_0 = arith.constant 0 : i32
    %c0_i32_1 = arith.constant 0 : i32
    return %c0_i32, %c0_i32_0 : i32, i32
  }
  func.func @transform_5(%arg0: i32, %arg1: i32) -> (i32, i32) {
    %c0_i32 = arith.constant 0 : i32
    %c0_i32_0 = arith.constant 0 : i32
    %c0_i32_1 = arith.constant 0 : i32
    return %c0_i32, %c0_i32_0 : i32, i32
  }
  func.func @transform_6(%arg0: i32, %arg1: i32) -> i32 {
    %c0_i32 = arith.constant 0 : i32
    %c0_i32_0 = arith.constant 0 : i32
    return %c0_i32 : i32
  }
  func.func @transform_7(%arg0: i32, %arg1: i32) -> (i32, i32, i32) {
    %c0_i32 = arith.constant 0 : i32
    %c0_i32_0 = arith.constant 0 : i32
    %c0_i32_1 = arith.constant 0 : i32
    return %arg0, %c0_i32, %c0_i32_0 : i32, i32, i32
  }
}

</mosaic_0001>

<bundles_post_ra>
// kernel: tpu_custom_call.1
= control target key start
LH: loop header
LB: loop body
LE: loop exit
PB: predicated region body
PF: predicated region fallthrough
CT: control target
= control target key end

     0   :  { %12 = vsyncpa [#allocation3], 0  ;;  %s719_s0 = inlined_call_operand.hbm [shape: f32[16,32], index: 0, kind: input, shape index: {}]   ;;  %s720_s1 = inlined_call_operand.vmem [shape: f32[16,1], index: 1, kind: input, shape index: {}]   ;;  %s721_s2 = inlined_call_operand.vmem [shape: s32[16,1], index: 2, kind: input, shape index: {}]   ;;  %s722_s3 = inlined_call_operand.vmem [shape: f32[32,64], index: 3, kind: input, shape index: {}]   ;;  %s723_s4 = inlined_call_operand.vmem [shape: f32[1,64], index: 4, kind: input, shape index: {}]   ;;  %s724_s5 = inlined_call_operand.hbm [shape: f32[64,128], index: 5, kind: input, shape index: {}]   ;;  %s725_s6 = inlined_call_operand.vmem [shape: f32[2], index: 6, kind: input, shape index: {}]   ;;  %s726_s7 = inlined_call_operand.hbm [shape: f32[1,1,128], index: 7, kind: output, shape index: {}]  }
   0x1   :  { %13 = vsyncpa [#allocation7], 0 }
   0x2   :  { %14 = vsyncpa [#allocation5], 0 }
   0x3   :  { %15 = vsyncpa [#allocation4], 0  ;;  %s603_s24 = smov [#allocation2]   ;;  %s517_s28 = scalar_lea.hbm %s719_s0, 256 }
   0x4   :  { %s25_s25 = sshll.u32 %s603_s24, 4  ;;  %p518_p0 = scmp.ne.s32.totalorder %s719_s0, %s517_s28  ;;  %s26_s25 = int_to_ptr.vmem [resolvable:$true] %s25_s25 }
   0x5   :  { %p521_p1 = scmp.lt.u32.totalorder %s517_s28, %s719_s0 }
   0x7   :  { %p523_p2 = pnand %p521_p1, %p518_p0 }
   0x9   :  { %526 = shalt.err (!%p523_p2)
}
   0xa   :  { %s527_s10 = scalar_lea.vmem %s26_s25, 256  ;;  %p532_p4 = scmp.lt.s32.totalorder %s26_s25, %s26_s25 }
   0xb   :  { %p528_p3 = scmp.ne.s32.totalorder %s26_s25, %s527_s10  ;;  %p533_p5 = scmp.lt.s32.totalorder %s527_s10, %s527_s10 }
   0xd   :  { %p534_p6 = por %p533_p5, %p532_p4 }
   0xf   :  { %p535_p7 = pnand %p534_p6, %p528_p3 }
  0x11   :  { %538 = shalt.err (!%p535_p7)
}
  0x12   :  { %s604_s11 = smov 128   ;;  %s605_s12 = smov 8  }
  0x13   :  { %31 = dma.hbm_to_vmem [thread:$0]  %s719_s0, 256, %s26_s25, [#allocation3], %s604_s11, %s604_s11, %s605_s12  }
  0x14   :  { %s606_s15 = smov [#allocation6]   ;;  %s74_s19 = sshll.u32 %s725_s6, 4  ;;  %s75_s19 = int_to_ptr.vmem [resolvable:$true] %s74_s19 }
  0x15   :  { %s61_s16 = sshll.u32 %s606_s15, 4  ;;  %s539_s22 = scalar_lea.hbm %s724_s5, 1024  ;;  %s62_s16 = int_to_ptr.vmem [resolvable:$true] %s61_s16 }
  0x16   :  { %p540_p8 = scmp.ne.s32.totalorder %s724_s5, %s539_s22  ;;  %p543_p9 = scmp.lt.u32.totalorder %s539_s22, %s724_s5 }
  0x18   :  { %p545_p10 = pnand %p543_p9, %p540_p8 }
  0x1a   :  { %548 = shalt.err (!%p545_p10)
}
  0x1b   :  { %s549_s0 = scalar_lea.vmem %s62_s16, 1024  ;;  %p554_p12 = scmp.lt.s32.totalorder %s62_s16, %s62_s16 }
  0x1c   :  { %p550_p11 = scmp.ne.s32.totalorder %s62_s16, %s549_s0  ;;  %p555_p13 = scmp.lt.s32.totalorder %s549_s0, %s549_s0 }
  0x1e   :  { %p556_p0 = por %p555_p13, %p554_p12 }
  0x20   :  { %p557_p1 = pnand %p556_p0, %p550_p11 }
  0x22   :  { %560 = shalt.err (!%p557_p1)
}
  0x23   :  { %67 = dma.hbm_to_vmem [thread:$0]  %s724_s5, 1024, %s62_s16, [#allocation7], %s604_s11, %s604_s11, %s605_s12  }
  0x24   :  { %s561_s28 = scalar_lea.vmem %s75_s19, 16  ;;  %p566_p3 = scmp.lt.s32.totalorder %s75_s19, %s75_s19 }
  0x25   :  { %p562_p2 = scmp.ne.s32.totalorder %s75_s19, %s561_s28  ;;  %p567_p4 = scmp.lt.s32.totalorder %s561_s28, %s561_s28 }
  0x27   :  { %p568_p5 = por %p567_p4, %p566_p3 }
  0x29   :  { %p569_p6 = pnand %p568_p5, %p562_p2 }
  0x2b   :  { %572 = shalt.err (!%p569_p6)
}
  0x2c   :  { %s607_s29 = smov [#allocation8]  }
  0x2d   :  { %77 = dma.vmem_to_smem %s75_s19, 16, %s607_s29, [#allocation5]  }
  0x2e   :  { %595 = dma.done.wait [#allocation3], 256  }
  0x2f   :  { %596 = vsyncadd [#allocation3], 4294967040 }
  0x30   :  { %597 = dma.done.wait [#allocation7], 1024  }
  0x31   :  { %598 = vsyncadd [#allocation7], 4294966272 }
  0x32   :  { %599 = dma.done.wait [#allocation5], 16  }
  0x33   :  { %600 = vsyncadd [#allocation5], 4294967280 }
  0x34   :  { %87 = sfence }
  0x35   :  { %v125_v0 = vld [vmem:[%s722_s3] sm:$0xff]  ;;  %v126_v1 = vld [vmem:[%s722_s3 + $0x8] sm:$0xff]  ;;  %v127_v2 = vld [vmem:[%s722_s3 + $0x10] sm:$0xff]  ;;  %vm136_vm0 = vcmask 261120   ;;  %vm228_vm1 = vcmask 523264   ;;  %v608_v28 = vmov 0  }
  0x36   :  { %v472_v3 = vpack.c.bf16 %v126_v1, %v125_v0  ;;  %v128_v4 = vld [vmem:[%s722_s3 + $0x18] sm:$0xff]  ;;  %v123_v5 = vld [vmem:[#allocation2] sm:$0xff]  ;;  %v124_v7 = vld [vmem:[#allocation2 + $0x8] sm:$0xff]  ;;  %506 = vset.pattern.permute.xlu1 %v608_v28  ;;  %s310_s22 = sld [smem:[#allocation8]]  ;;  %v609_v38 = vmov 1   ;;  %s612_s23 = smov [#allocation9]  }
  0x37   :  { %v476_v6 = vpack.c.bf16 %v128_v4, %v127_v2  ;;  %450 = vmatprep.mubr.msk.f32.mxu0 %vm136_vm0, %v123_v5  ;;  %v220_v8 = vld [vmem:[#allocation6] sm:$0xff]  ;;  %v221_v9 = vld [vmem:[#allocation6 + $0x8] sm:$0xff]  ;;  %v222_v11 = vld [vmem:[#allocation6 + $0x10] sm:$0xff]  ;;  %507 = vset.pattern.permute.xlu0 %v609_v38  ;;  %v358_v5 = vlaneseq  ;;  %s397_s24 = sshll.u32 %s612_s23, 4  ;;  %s398_s24 = int_to_ptr.vmem [resolvable:$true] %s397_s24 }
  0x38   :  { %473 = vmatprep.subr.bf16.mxu0 %v472_v3  ;;  %v480_v10 = vpack.c.bf16 %v221_v9, %v220_v8  ;;  %v223_v12 = vld [vmem:[#allocation6 + $0x18] sm:$0xff]  ;;  %v224_v14 = vld [vmem:[#allocation6 + $0x20] sm:$0xff]  ;;  %v225_v15 = vld [vmem:[#allocation6 + $0x28] sm:$0xff]  ;;  %s573_s26 = scalar_lea.vmem %s398_s24, 16  ;;  %s577_s27 = scalar_lea.vmem %s398_s24, 32 }
  0x39   :  { %475 = vmatpush3.bf16.msra.mxu0 %v472_v3  ;;  %v484_v13 = vpack.c.bf16 %v223_v12, %v222_v11  ;;  %v226_v16 = vld [vmem:[#allocation6 + $0x30] sm:$0xff]  ;;  %v488_v17 = vpack.c.bf16 %v225_v15, %v224_v14  ;;  %v227_v18 = vld [vmem:[#allocation6 + $0x38] sm:$0xff]  ;;  %v611_v3 = vmov 0.0   ;;  %p574_p7 = scmp.ne.s32.totalorder %s398_s24, %s573_s26  ;;  %p578_p8 = scmp.lt.s32.totalorder %s398_s24, %s398_s24 }
  0x3a   :  { %477 = vmatprep.subr.bf16.mxu0 %v476_v6  ;;  %481 = vmatprep.subr.bf16.mxu1 %v480_v10  ;;  %v492_v19 = vpack.c.bf16 %v227_v18, %v226_v16  ;;  %v420_v20 = vld [vmem:[%s723_s4] ss:$0 sm:$0xff]  ;;  %v357_v29 = vld [vmem:[%s721_s2 + $0x8] sm:$0xff]  ;;  %122 = vst [vmem:[#allocation9] sm:$0x1] %v611_v3  ;;  %p579_p9 = scmp.lt.s32.totalorder %s577_s27, %s573_s26 }
  0x3b   :  { %483 = vmatpush3.bf16.msra.mxu1 %v480_v10  ;;  %v356_v27 = vld [vmem:[%s721_s2] sm:$0xff]  ;;  %v325_v31 = vld [vmem:[%s720_s1 + $0x8] sm:$0xff]  ;;  %s425_s2 = sld [smem:[#allocation8 + $0x1]] }
  0x3c   :  { %485 = vmatprep.subr.bf16.mxu1 %v484_v13  ;;  %361 = vperm.xlu1 %506, %v356_v27   ;;  %v324_v30 = vld [vmem:[%s720_s1] sm:$0xff]  ;;  %v313_v36 = vstv %s310_s22  ;;  %vm335_vm3 = vcmp.eq.f32.partialorder %v325_v31, inf  ;;  %v338_v45 = vand.u32 2147483648, %v325_v31  ;;  %vm337_vm5 = vcmp.eq.f32.partialorder %v325_v31, 0.0  ;;  %s610_s1 = smov 1   ;;  %p580_p10 = por %p579_p9, %p578_p8 }
  0x3d   :  { %479 = vmatpush3.bf16.msra.mxu0 %v476_v6  ;;  %vm328_vm2 = vcmp.eq.f32.partialorder %v324_v30, inf  ;;  %v331_v41 = vand.u32 2147483648, %v324_v30  ;;  %vm330_vm4 = vcmp.eq.f32.partialorder %v324_v30, 0.0  ;;  %v359_v6 = vand.u32 127, %v358_v5 }
  0x3e   :  { %p581_p11 = pnand %p580_p10, %p574_p7 }
  0x3f   :  { %487 = vmatpush3.bf16.msra.mxu1 %v484_v13 }
  0x40   :  { %451 = vmatmul.mubr.msk.f32.vlgmr.msra.gmra.mrb[0].mxu0 %vm136_vm0, %v124_v7  ;;  %489 = vmatprep.subr.bf16.mxu1 %v488_v17 }
  0x41   :  { %364 = vperm.xlu1 %506, %v357_v29   ;;  %v319_v56 = vstv %s425_s2  ;;  %v388_v18 = vld [vmem:[#allocation9] sm:$0x1] }
  0x43   :  { %491 = vmatpush3.bf16.msra.mxu1 %v488_v17 }
  0x44   :  { %493 = vmatprep.subr.bf16.mxu1 %v492_v19 }
  0x45   :  { %508 = vset.pattern.permute.xlu1 %v609_v38 }
  0x47   :  { %495 = vmatpush3.bf16.msra.mxu1 %v492_v19 }
  0xbb   :  { %v362_v4 = vpop.permute.xlu1 %361 }
  0xbc   :  { %vm366_vm6 = vcmp.eq.s32.totalorder %v362_v4, %v359_v6 }
  0xc0   :  { %v365_v7 = vpop.permute.xlu1 %364 }
  0xc1   :  { %vm367_vm7 = vcmp.eq.s32.totalorder %v365_v7, %v359_v6 }
 0x113   :  { %v452_v21 = vpop.f32.mrb[0].mxu0 }
 0x114   :  { %v215_v22 = vadd.f32 %v452_v21, %v420_v20  ;;  %v209_v23 = vpop.f32.mrb[1].mxu0 }
 0x115   :  { %v210_v24 = vadd.f32 %v420_v20, %v209_v23 }
 0x117   :  { %509 = vtanh.f32 %v210_v24 }
 0x118   :  { %511 = vtanh.f32 %v215_v22 }
 0x119   :  { %513 = vrsqrt.f32 %v324_v30 }
 0x11a   :  { %515 = vrsqrt.f32 %v325_v31 }
 0x121   :  { %v510_v25 = vpop.eup %509 }
 0x122   :  { %v512_v26 = vpop.eup %511  ;;  %469 = vmatprep.mubr.msk.f32.mxu1 %vm228_vm1, %v510_v25 }
 0x123   :  { %470 = vmatmul.mubr.msk.f32.vlgmr.msra.gmra.mrb[0].mxu1 %vm228_vm1, %v512_v26  ;;  %v514_v32 = vpop.eup %513 }
 0x124   :  { %v516_v33 = vpop.eup %515  ;;  %v327_v34 = vmul.f32 %v514_v32, %v324_v30 }
 0x125   :  { %v334_v37 = vmul.f32 %v516_v33, %v325_v31 }
 0x126   :  { %v329_v43 = vsel %vm328_vm2, %v324_v30, %v327_v34 }
 0x127   :  { %v336_v47 = vsel %vm335_vm3, %v325_v31, %v334_v37  ;;  %v332_v48 = vsel %vm330_vm4, %v331_v41, %v329_v43 }
 0x128   :  { %v339_v51 = vsel %vm337_vm5, %v338_v45, %v336_v47 }
 0x1f6   :  { %v471_v35 = vpop.f32.mrb[0].mxu1 }
 0x1f7   :  { %v312_v39 = vmul.f32 0.1, %v471_v35  ;;  %v301_v40 = vpop.f32.mrb[1].mxu1  ;;  %v321_v58 = vadd.f32 %v471_v35, %v319_v56 }
 0x1f8   :  { %v311_v42 = vmul.f32 0.1, %v301_v40  ;;  %v320_v57 = vadd.f32 %v319_v56, %v301_v40 }
 0x1f9   :  { %v315_v44 = vadd.f32 %v313_v36, %v312_v39  ;;  %v323_v61 = vmul.f32 %v321_v58, %v321_v58 }
 0x1fa   :  { %v314_v46 = vadd.f32 %v313_v36, %v311_v42  ;;  %v322_v59 = vmul.f32 %v320_v57, %v320_v57 }
 0x1fb   :  { %v317_v50 = vmul.f32 %v315_v44, %v315_v44  ;;  %v341_v0 = vmul.f32 0.5, %v323_v61 }
 0x1fc   :  { %v316_v49 = vmul.f32 %v314_v46, %v314_v46  ;;  %v340_v60 = vmul.f32 0.5, %v322_v59 }
 0x1fd   :  { %v343_v54 = vsub.f32 %v339_v51, %v317_v50 }
 0x1fe   :  { %v342_v52 = vsub.f32 %v332_v48, %v316_v49 }
 0x1ff   :  { %v345_v55 = vmul.f32 %v343_v54, %v343_v54 }
 0x200   :  { %v344_v53 = vmul.f32 %v342_v52, %v342_v52 }
 0x202   :  { %348 = vrot.lane.b32.xlu0 %v344_v53, %s610_s1 }
 0x206   :  { %350 = vrot.lane.b32.xlu0 %v345_v55, %s610_s1 }
 0x274   :  { %v349_v62 = vpop.permute.xlu0 %348 }
 0x275   :  { %v354_v63 = vmul.f32 %v349_v62, %v340_v60 }
 0x277   :  { %370 = vperm.xlu0 %507, %v354_v63  }
 0x278   :  { %v351_v1 = vpop.permute.xlu0 %350 }
 0x279   :  { %v355_v2 = vmul.f32 %v351_v1, %v341_v0 }
 0x27b   :  { %375 = vperm.xlu1 %508, %v355_v2  }
 0x2f6   :  { %v371_v8 = vpop.permute.xlu0 %370 }
 0x2f7   :  { %v378_v10 = vsel %vm366_vm6, %v371_v8, 0.0 }
 0x2fa   :  { %v376_v9 = vpop.permute.xlu1 %375 }
 0x2fb   :  { %v379_v11 = vsel %vm367_vm7, %v376_v9, 0.0 }
 0x2fc   :  { %v380_v12 = vadd.f32 %v379_v11, %v378_v10 }
 0x2fe   :  { %v381_v13 = vrot.slane %v380_v12, 4 }
 0x300   :  { %v382_v14 = vadd.f32 %v381_v13, %v380_v12 }
 0x302   :  { %v383_v15 = vrot.slane %v382_v14, 2 }
 0x304   :  { %v384_v16 = vadd.f32 %v383_v15, %v382_v14 }
 0x306   :  { %v385_v17 = vrot.slane %v384_v16, 1 }
 0x308   :  { %v386_v19 = vadd.f32 %v385_v17, %v384_v16 }
 0x30a   :  { %v389_v20 = vadd.f32 %v388_v18, %v386_v19 }
 0x30c   :  { %390 = vst [vmem:[#allocation9] sm:$0x1] %v389_v20 }
 0x30d   :  { %584 = shalt.err (!%p581_p11)
}
 0x30e   :  { %s585_s25 = scalar_lea.hbm %s726_s7, 16 }
 0x30f   :  { %p586_p12 = scmp.ne.s32.totalorder %s726_s7, %s585_s25  ;;  %p589_p13 = scmp.lt.u32.totalorder %s585_s25, %s726_s7 }
 0x311   :  { %p591_p0 = pnand %p589_p13, %p586_p12 }
 0x313   :  { %594 = shalt.err (!%p591_p0)
}
 0x314   :  { %400 = dma.vmem_to_hbm [thread:$0]  %s398_s24, 16, %s726_s7, [#allocation4]  }
 0x315   :  { %601 = dma.done.wait [#allocation4], 16  }
 0x316   :  { %602 = vsyncadd [#allocation4], 4294967280 }
 0x317   :  { %404 = vsyncpa [#allocation3], 1 }
 0x318   :  { %405 = vsyncpa [#allocation7], 1 }
 0x319   :  { %406 = vsyncpa [#allocation4], 1 }
 0x31a   :  { %407 = vsyncpa [#allocation5], 1 }

</bundles_post_ra>
